<compile_context>
chip_gen: v6e
topology: v6e:2x2x1
jax: 0.10.0
libtpu: 0.0.40
codegen_flags: <defaults>
</compile_context>

<pallas_src>
import jax
import jax.numpy as jnp
from jax.experimental import pallas as pl
from jax.experimental.pallas import tpu as pltpu

INPUT_SIZE = 784
HIDDEN = 50
NUM_CLASSES = 10

HIDDEN_PAD = 64      # 50 -> 64  (sublane/MXU friendly)
CLASSES_PAD = 128    # 10 -> 128 (lane-dense output tile, unmasked stores)


def _round_up(n, m):
    return ((n + m - 1) // m) * m


def mlp_kernel(x_ref, w1_ref, b1_ref, w2_ref, b2_ref, o_ref):
    # Cast x to bf16 in-kernel (VPU, hidden under DMA) -- avoids a wrapper-side
    # HBM round trip for the cast.
    x = x_ref[...].astype(jnp.bfloat16)
    # fc1: bf16 x @ bf16 W1 on the MXU, f32 accumulation, bias + ReLU on VPU
    h = jnp.dot(x, w1_ref[...], preferred_element_type=jnp.float32)
    h = jnp.maximum(h + b1_ref[...], 0.0)          # b1 is (1, HIDDEN_PAD) f32
    # fc2: cast activations back to bf16 for the MXU, accumulate in f32
    out = jnp.dot(h.astype(w2_ref.dtype), w2_ref[...],
                  preferred_element_type=jnp.float32)
    # Store bf16 logits (halves output HBM traffic); accumulation stayed f32.
    o_ref[...] = (out + b2_ref[...]).astype(o_ref.dtype)


def _choose_tb(B, tb):
    """Batch tile: full-dim block for tiny B, otherwise multiple of 16,
    split so large batches get >= 4 grid steps (pipelining / 2-TC sharding)."""
    if B <= 16:
        return B                         # block == full array dim -> always legal
    TB = min(tb, _round_up(B, 16))
    min_steps = 4
    if B >= 1024 and pl.cdiv(B, TB) < min_steps:
        TB = _round_up(pl.cdiv(B, min_steps), 256)
    return TB


def _vmem_limit_bytes(TB, x_itemsize):
    """Actual footprint: double-buffered x + out tiles, resident weights,
    plus margin for Mosaic internal scratch (incl. the f32 h intermediate)."""
    x_tile = TB * INPUT_SIZE * x_itemsize
    o_tile = TB * CLASSES_PAD * 2                      # bf16 output
    weights = ((INPUT_SIZE * HIDDEN_PAD + HIDDEN_PAD * CLASSES_PAD) * 2
               + (HIDDEN_PAD + CLASSES_PAD) * 4)
    footprint = 2 * (x_tile + o_tile) + weights
    limit = int(footprint * 1.5) + (8 << 20)
    return max(min(limit, 48 << 20), 16 << 20)         # stay well below v7x 64 MiB


def nn_forward(x, w1p, b1p, w2p, b2p, *, tb=2048):
    """x: [B, 784] float (f32 fine -- cast to bf16 happens inside the kernel).
    w1p: [784, 64] bf16, b1p: [1, 64] f32, w2p: [64, 128] bf16, b2p: [1, 128] f32
    (padded + pre-transposed packed params from `pack_params`).
    Returns [B, 10] bf16 logits (f32-accumulated)."""
    B = x.shape[0]
    TB = _choose_tb(B, tb)
    grid = (pl.cdiv(B, TB),)

    out = pl.pallas_call(
        mlp_kernel,
        out_shape=jax.ShapeDtypeStruct((B, CLASSES_PAD), jnp.bfloat16),
        grid=grid,
        in_specs=[
            # x: batch-tiled, double-buffered by the pipeline (boundary block masked)
            pl.BlockSpec((TB, INPUT_SIZE), lambda i: (i, 0)),
            # weights / biases: constant index_map -> VMEM-resident, no re-DMA
            pl.BlockSpec((INPUT_SIZE, HIDDEN_PAD), lambda i: (0, 0)),
            pl.BlockSpec((1, HIDDEN_PAD), lambda i: (0, 0)),
            pl.BlockSpec((HIDDEN_PAD, CLASSES_PAD), lambda i: (0, 0)),
            pl.BlockSpec((1, CLASSES_PAD), lambda i: (0, 0)),
        ],
        out_specs=pl.BlockSpec((TB, CLASSES_PAD), lambda i: (i, 0)),
        compiler_params=pltpu.CompilerParams(
            dimension_semantics=("parallel",),
            vmem_limit_bytes=_vmem_limit_bytes(TB, jnp.dtype(x.dtype).itemsize),
        ),
    )(x, w1p, b1p, w2p, b2p)

    return out[:, :NUM_CLASSES]


def init_params(key):
    """Logical (unpadded, f32) params mimicking nn.Linear's uniform init.
    Weights are stored pre-transposed as [in_features, out_features]."""
    k1, k2, k3, k4 = jax.random.split(key, 4)
    lim1 = 1.0 / jnp.sqrt(INPUT_SIZE)
    lim2 = 1.0 / jnp.sqrt(HIDDEN)
    w1 = jax.random.uniform(k1, (INPUT_SIZE, HIDDEN), jnp.float32, -lim1, lim1)
    b1 = jax.random.uniform(k2, (HIDDEN,), jnp.float32, -lim1, lim1)
    w2 = jax.random.uniform(k3, (HIDDEN, NUM_CLASSES), jnp.float32, -lim2, lim2)
    b2 = jax.random.uniform(k4, (NUM_CLASSES,), jnp.float32, -lim2, lim2)
    return w1, b1, w2, b2


def pack_params(w1, b1, w2, b2):
    """Pad to lane-friendly shapes and cast matmul operands to bf16."""
    w1p = jnp.zeros((INPUT_SIZE, HIDDEN_PAD), jnp.float32).at[:, :HIDDEN].set(w1)
    b1p = jnp.zeros((1, HIDDEN_PAD), jnp.float32).at[0, :HIDDEN].set(b1)
    w2p = jnp.zeros((HIDDEN_PAD, CLASSES_PAD), jnp.float32).at[:HIDDEN, :NUM_CLASSES].set(w2)
    b2p = jnp.zeros((1, CLASSES_PAD), jnp.float32).at[0, :NUM_CLASSES].set(b2)
    # Biases stay f32 (added to the f32 accumulator); weights feed the MXU as bf16.
    return w1p.astype(jnp.bfloat16), b1p, w2p.astype(jnp.bfloat16), b2p


def reference_forward(x, w1, b1, w2, b2):
    h = jnp.maximum(x @ w1 + b1, 0.0)
    return h @ w2 + b2


if __name__ == "__main__":
    key = jax.random.PRNGKey(0)
    kx, kp = jax.random.split(key)
    batch = 2
    x = jax.random.normal(kx, (batch, INPUT_SIZE), jnp.float32)
    w1, b1, w2, b2 = init_params(kp)
    w1p, b1p, w2p, b2p = pack_params(w1, b1, w2, b2)

    out = nn_forward(x, w1p, b1p, w2p, b2p)
    out = jax.block_until_ready(out)

    ref = reference_forward(x, w1, b1, w2, b2)
    assert out.shape == (batch, NUM_CLASSES)
    # bf16 matmul inputs + bf16 output with f32 accumulation -> looser tolerance.
    err = jnp.max(jnp.abs(out.astype(jnp.float32) - ref))
    assert jnp.allclose(out.astype(jnp.float32), ref, atol=3e-2, rtol=3e-2), (
        f"max abs err {err}")
    print("KERNEL_OK")
</pallas_src>

<mosaic_0001>
module attributes {stable_mosaic.version = 11 : i64} {
  func.func @mlp_kernel(%arg0: i32, %arg1: memref<2x784xf32, #tpu.memory_space<vmem>>, %arg2: memref<784x64xbf16, #tpu.memory_space<vmem>>, %arg3: memref<1x64xf32, #tpu.memory_space<vmem>>, %arg4: memref<64x128xbf16, #tpu.memory_space<vmem>>, %arg5: memref<1x128xf32, #tpu.memory_space<vmem>>, %arg6: memref<2x128xbf16, #tpu.memory_space<vmem>>) attributes {dimension_semantics = [#tpu.dimension_semantics<parallel>], iteration_bounds = array<i64: 1>, scalar_prefetch = 0 : i64, scratch_operands = 0 : i64, tpu.core_type = #tpu.core_type<tc>, window_params = [{transform_indices = @transform_0, window_bounds = array<i64: 2, 784>}, {pipeline_mode = #tpu.pipeline_mode<synchronous>, transform_indices = @transform_1, window_bounds = array<i64: 784, 64>}, {pipeline_mode = #tpu.pipeline_mode<synchronous>, transform_indices = @transform_2, window_bounds = array<i64: 1, 64>}, {pipeline_mode = #tpu.pipeline_mode<synchronous>, transform_indices = @transform_3, window_bounds = array<i64: 64, 128>}, {pipeline_mode = #tpu.pipeline_mode<synchronous>, transform_indices = @transform_4, window_bounds = array<i64: 1, 128>}, {transform_indices = @transform_5, window_bounds = array<i64: 2, 128>}]} {
    %c0 = arith.constant 0 : index
    %c0_0 = arith.constant 0 : index
    %0 = vector.load %arg1[%c0, %c0_0] : memref<2x784xf32, #tpu.memory_space<vmem>>, vector<2x784xf32>
    %1 = arith.truncf %0 : vector<2x784xf32> to vector<2x784xbf16>
    %c0_1 = arith.constant 0 : index
    %c0_2 = arith.constant 0 : index
    %2 = vector.load %arg2[%c0_1, %c0_2] : memref<784x64xbf16, #tpu.memory_space<vmem>>, vector<784x64xbf16>
    %cst = arith.constant dense<0.000000e+00> : vector<2x64xf32>
    %3 = tpu.matmul %1, %2, %cst {dimension_numbers = #tpu.dot_dimension_numbers<[1], [0], [0], [1], [0, 0, 1, 1], [], []>} : vector<2x784xbf16>, vector<784x64xbf16>, vector<2x64xf32> -> vector<2x64xf32>
    %c0_3 = arith.constant 0 : index
    %c0_4 = arith.constant 0 : index
    %4 = vector.load %arg3[%c0_3, %c0_4] : memref<1x64xf32, #tpu.memory_space<vmem>>, vector<1x64xf32>
    %5 = vector.broadcast %4 : vector<1x64xf32> to vector<2x64xf32>
    %6 = arith.addf %3, %5 : vector<2x64xf32>
    %cst_5 = arith.constant 0.000000e+00 : f32
    %7 = vector.broadcast %cst_5 : f32 to vector<2x64xf32>
    %8 = arith.maximumf %6, %7 : vector<2x64xf32>
    %9 = arith.truncf %8 : vector<2x64xf32> to vector<2x64xbf16>
    %c0_6 = arith.constant 0 : index
    %c0_7 = arith.constant 0 : index
    %10 = vector.load %arg4[%c0_6, %c0_7] : memref<64x128xbf16, #tpu.memory_space<vmem>>, vector<64x128xbf16>
    %cst_8 = arith.constant dense<0.000000e+00> : vector<2x128xf32>
    %11 = tpu.matmul %9, %10, %cst_8 {dimension_numbers = #tpu.dot_dimension_numbers<[1], [0], [0], [1], [0, 0, 1, 1], [], []>} : vector<2x64xbf16>, vector<64x128xbf16>, vector<2x128xf32> -> vector<2x128xf32>
    %c0_9 = arith.constant 0 : index
    %c0_10 = arith.constant 0 : index
    %12 = vector.load %arg5[%c0_9, %c0_10] : memref<1x128xf32, #tpu.memory_space<vmem>>, vector<1x128xf32>
    %13 = vector.broadcast %12 : vector<1x128xf32> to vector<2x128xf32>
    %14 = arith.addf %11, %13 : vector<2x128xf32>
    %15 = arith.truncf %14 : vector<2x128xf32> to vector<2x128xbf16>
    %c0_11 = arith.constant 0 : index
    %c0_12 = arith.constant 0 : index
    %16 = vector.load %arg6[%c0_11, %c0_12] : memref<2x128xbf16, #tpu.memory_space<vmem>>, vector<2x128xbf16>
    tpu.vector_store %arg6[%c0_11, %c0_12], %15 {strides = array<i32>} : memref<2x128xbf16, #tpu.memory_space<vmem>>, vector<2x128xbf16>,
    return
  }
  func.func @transform_0(%arg0: i32) -> (i32, i32) {
    %c0_i32 = arith.constant 0 : i32
    %c0_i32_0 = arith.constant 0 : i32
    return %arg0, %c0_i32 : i32, i32
  }
  func.func @transform_1(%arg0: i32) -> (i32, i32) {
    %c0_i32 = arith.constant 0 : i32
    %c0_i32_0 = arith.constant 0 : i32
    %c0_i32_1 = arith.constant 0 : i32
    return %c0_i32, %c0_i32_0 : i32, i32
  }
  func.func @transform_2(%arg0: i32) -> (i32, i32) {
    %c0_i32 = arith.constant 0 : i32
    %c0_i32_0 = arith.constant 0 : i32
    %c0_i32_1 = arith.constant 0 : i32
    return %c0_i32, %c0_i32_0 : i32, i32
  }
  func.func @transform_3(%arg0: i32) -> (i32, i32) {
    %c0_i32 = arith.constant 0 : i32
    %c0_i32_0 = arith.constant 0 : i32
    %c0_i32_1 = arith.constant 0 : i32
    return %c0_i32, %c0_i32_0 : i32, i32
  }
  func.func @transform_4(%arg0: i32) -> (i32, i32) {
    %c0_i32 = arith.constant 0 : i32
    %c0_i32_0 = arith.constant 0 : i32
    %c0_i32_1 = arith.constant 0 : i32
    return %c0_i32, %c0_i32_0 : i32, i32
  }
  func.func @transform_5(%arg0: i32) -> (i32, i32) {
    %c0_i32 = arith.constant 0 : i32
    %c0_i32_0 = arith.constant 0 : i32
    return %arg0, %c0_i32 : i32, i32
  }
}

</mosaic_0001>

<bundles_post_ra>
// kernel: tpu_custom_call.1
= control target key start
LH: loop header
LB: loop body
LE: loop exit
PB: predicated region body
PF: predicated region fallthrough
CT: control target
= control target key end

     0   :  { %v30_v27 = vlaneseq  ;;  %v966_v35 = vmov 1983009808   ;;  %v967_v40 = vmov 0.0   ;;  %vm968_vm0 = vmmov 0   ;;  %s1183_s0 = inlined_call_operand.vmem [shape: f32[2,784], index: 0, kind: input, shape index: {}]   ;;  %s1184_s1 = inlined_call_operand.vmem [shape: bf16[784,64], index: 1, kind: input, shape index: {}]   ;;  %s1185_s2 = inlined_call_operand.vmem [shape: f32[1,64], index: 2, kind: input, shape index: {}]   ;;  %s1186_s3 = inlined_call_operand.vmem [shape: bf16[64,128], index: 3, kind: input, shape index: {}]   ;;  %s1187_s4 = inlined_call_operand.vmem [shape: f32[1,128], index: 4, kind: input, shape index: {}]   ;;  %s1188_s5 = inlined_call_operand.hbm [shape: bf16[2,128], index: 5, kind: output, shape index: {}]  }
   0x1   :  { %v889_v0 = vld [vmem:[%s1184_s1 + $0x78] sm:$0xff]   ;;  %v893_v4 = vld [vmem:[%s1184_s1 + $0x70] sm:$0xff]   ;;  %v897_v8 = vld [vmem:[%s1184_s1 + $0x68] sm:$0xff]   ;;  %v28_v36 = vunpack.c.l.s4 %v966_v35 }
   0x2   :  { %v890_v1 = vld [vmem:[%s1184_s1 + $0x38] sm:$0xff]   ;;  %794 = vmatprep.subr.bf16.mxu0 %v889_v0  ;;  %v894_v5 = vld [vmem:[%s1184_s1 + $0x30] sm:$0xff]   ;;  %v898_v9 = vld [vmem:[%s1184_s1 + $0x28] sm:$0xff]   ;;  %v31_v32 = vshrl.u32 %v30_v27, 7 }
   0x3   :  { %v891_v2 = vld [vmem:[%s1184_s1 + $0xf8] sm:$0xff]   ;;  %795 = vmatpush3.bf16.msra.mxu0 %v890_v1  ;;  %v895_v6 = vld [vmem:[%s1184_s1 + $0xf0] sm:$0xff]   ;;  %v899_v10 = vld [vmem:[%s1184_s1 + $0xe8] sm:$0xff]   ;;  %v29_v38 = vunpack.c.0.s8 %v28_v36 }
   0x4   :  { %v892_v3 = vld [vmem:[%s1184_s1 + $0xb8] sm:$0xff]   ;;  %816 = vmatprep.subr.bf16.mxu1 %v891_v2  ;;  %796 = vmatprep.subr.bf16.mxu0 %v893_v4  ;;  %v896_v7 = vld [vmem:[%s1184_s1 + $0xb0] sm:$0xff]   ;;  %v900_v11 = vld [vmem:[%s1184_s1 + $0xa8] sm:$0xff]  }
   0x5   :  { %817 = vmatpush3.bf16.msra.mxu1 %v892_v3  ;;  %v901_v12 = vld [vmem:[%s1184_s1 + $0x60] sm:$0xff]   ;;  %v905_v16 = vld [vmem:[%s1184_s1 + $0x58] sm:$0xff]   ;;  %v909_v20 = vld [vmem:[%s1184_s1 + $0x50] sm:$0xff]   ;;  %v32_v41 = vsub.s32 %v29_v38, %v31_v32 }
   0x6   :  { %818 = vmatprep.subr.bf16.mxu1 %v895_v6  ;;  %v902_v13 = vld [vmem:[%s1184_s1 + $0x20] sm:$0xff]   ;;  %v906_v17 = vld [vmem:[%s1184_s1 + $0x18] sm:$0xff]   ;;  %v910_v21 = vld [vmem:[%s1184_s1 + $0x10] sm:$0xff]  }
   0x7   :  { %797 = vmatpush3.bf16.msra.mxu0 %v894_v5  ;;  %v903_v14 = vld [vmem:[%s1184_s1 + $0xe0] sm:$0xff]   ;;  %v907_v18 = vld [vmem:[%s1184_s1 + $0xd8] sm:$0xff]   ;;  %v911_v22 = vld [vmem:[%s1184_s1 + $0xd0] sm:$0xff]  }
   0x8   :  { %798 = vmatprep.subr.bf16.mxu0 %v897_v8  ;;  %v904_v15 = vld [vmem:[%s1184_s1 + $0xa0] sm:$0xff]   ;;  %v908_v19 = vld [vmem:[%s1184_s1 + $0x98] sm:$0xff]   ;;  %v912_v23 = vld [vmem:[%s1184_s1 + $0x90] sm:$0xff]  }
   0x9   :  { %819 = vmatpush3.bf16.msra.mxu1 %v896_v7  ;;  %v913_v24 = vld [vmem:[%s1184_s1 + $0x48] sm:$0xff]   ;;  %v917_v29 = vld [vmem:[%s1184_s1 + $0x40] sm:$0xff]   ;;  %v921_v37 = vld [vmem:[%s1184_s1 + $0x178] sm:$0xff]  }
   0xa   :  { %820 = vmatprep.subr.bf16.mxu1 %v899_v10  ;;  %v914_v25 = vld [vmem:[%s1184_s1 + $0x8] sm:$0xff]   ;;  %v918_v30 = vld [vmem:[%s1184_s1] sm:$0xff]   ;;  %v923_v50 = vld [vmem:[%s1184_s1 + $0x138] sm:$0xff]  }
   0xb   :  { %799 = vmatpush3.bf16.msra.mxu0 %v898_v9  ;;  %v915_v26 = vld [vmem:[%s1184_s1 + $0xc8] sm:$0xff]   ;;  %v919_v31 = vld [vmem:[%s1184_s1 + $0xc0] sm:$0xff]   ;;  %v924_v51 = vld [vmem:[%s1184_s1 + $0x170] sm:$0xff]  }
   0xc   :  { %800 = vmatprep.subr.bf16.mxu0 %v901_v12  ;;  %v916_v28 = vld [vmem:[%s1184_s1 + $0x88] sm:$0xff]   ;;  %v22_v33 = vld [vmem:[%s1183_s0] sm:$0xff]  ;;  %v925_v52 = vld [vmem:[%s1184_s1 + $0x130] sm:$0xff]  }
   0xd   :  { %821 = vmatpush3.bf16.msra.mxu1 %v900_v11  ;;  %v920_v34 = vld [vmem:[%s1184_s1 + $0x80] sm:$0xff]   ;;  %v26_v39 = vcombine.high %v22_v33, %v22_v33  ;;  %v33_v42 = vrot.slane %v22_v33, %v32_v41  ;;  %v926_v53 = vld [vmem:[%s1184_s1 + $0x168] sm:$0xff]  }
   0xe   :  { %822 = vmatprep.subr.bf16.mxu1 %v903_v14  ;;  %v927_v54 = vld [vmem:[%s1184_s1 + $0x128] sm:$0xff]   ;;  %v928_v55 = vld [vmem:[%s1184_s1 + $0x160] sm:$0xff]  }
   0xf   :  { %801 = vmatpush3.bf16.msra.mxu0 %v902_v13  ;;  %v40_v43 = vrot.slane %v26_v39, %v32_v41  ;;  %v41_v44 = vcombine.high %v33_v42, %v33_v42  ;;  %v66_v46 = vpack.c.bf16 %v33_v42, %v33_v42  ;;  %v938_v56 = vld [vmem:[%s1184_s1 + $0x180] sm:$0xff]   ;;  %v23_v57 = vld [vmem:[%s1183_s0 + $0x8] sm:$0x3f] }
  0x10   :  { %802 = vmatprep.subr.bf16.mxu0 %v905_v16  ;;  %v43_v58 = vcombine.high %v23_v57, %v23_v57  ;;  %v50_v59 = vrot.slane %v23_v57, %v32_v41 }
  0x11   :  { %823 = vmatpush3.bf16.msra.mxu1 %v904_v15  ;;  %v42_v45 = vcombine.high %v40_v43, %v40_v43  ;;  %v68_v47 = vpack.c.bf16 %v40_v43, %v40_v43  ;;  %v67_v48 = vpack.c.bf16 %v41_v44, %v41_v44 }
  0x12   :  { %824 = vmatprep.subr.bf16.mxu1 %v907_v18  ;;  %v57_v60 = vrot.slane %v43_v58, %v32_v41  ;;  %v58_v61 = vcombine.high %v50_v59, %v50_v59 }
  0x13   :  { %803 = vmatpush3.bf16.msra.mxu0 %v906_v17  ;;  %v69_v49 = vpack.c.bf16 %v42_v45, %v42_v45  ;;  %508 = vmatprep.mubr.bf16.mxu0 %v67_v48 }
  0x14   :  { %804 = vmatprep.subr.bf16.mxu0 %v909_v20 }
  0x15   :  { %825 = vmatpush3.bf16.msra.mxu1 %v908_v19  ;;  %548 = vmatprep.mubr.bf16.mxu1 %v69_v49 }
  0x16   :  { %826 = vmatprep.subr.bf16.mxu1 %v911_v22 }
  0x17   :  { %805 = vmatpush3.bf16.msra.mxu0 %v910_v21 }
  0x18   :  { %806 = vmatprep.subr.bf16.mxu0 %v913_v24 }
  0x19   :  { %827 = vmatpush3.bf16.msra.mxu1 %v912_v23 }
  0x1a   :  { %828 = vmatprep.subr.bf16.mxu1 %v915_v26 }
  0x1b   :  { %807 = vmatpush3.bf16.msra.mxu0 %v914_v25 }
  0x1c   :  { %808 = vmatprep.subr.bf16.mxu0 %v917_v29 }
  0x1d   :  { %829 = vmatpush3.bf16.msra.mxu1 %v916_v28 }
  0x1e   :  { %830 = vmatprep.subr.bf16.mxu1 %v919_v31 }
  0x1f   :  { %809 = vmatpush3.bf16.msra.mxu0 %v918_v30 }
  0x20   :  { %838 = vmatprep.subr.bf16.mxu0 %v921_v37 }
  0x21   :  { %831 = vmatpush3.bf16.msra.mxu1 %v920_v34 }
  0x22   :  { %867 = vmatprep.subr.bf16.mxu1 %v967_v40  ;;  %509 = vmatmul.mubr.bf16.vlgmr.msra.gmra.mxu0 %v66_v46 }
  0x23   :  { %839 = vmatpush3.bf16.msra.mxu0 %v923_v50 }
  0x24   :  { %549 = vmatmul.mubr.bf16.vlgmr.msra.gmra.mxu1 %v68_v47  ;;  %840 = vmatprep.subr.bf16.mxu0 %v924_v51 }
  0x25   :  { %869 = vmatprep.mubr.msk.bf16.mxu1 %vm968_vm0, %v967_v40  ;;  %868 = vmatpush3.bf16.msra.mxu1 %v938_v56 }
  0x26   :  { %873 = vmatprep.subr.bf16.mxu1 %v967_v40 }
  0x27   :  { %841 = vmatpush3.bf16.msra.mxu0 %v925_v52 }
  0x28   :  { %842 = vmatprep.subr.bf16.mxu0 %v926_v53 }
  0x29   :  { %10 = vsyncpa [#allocation3], 0  ;;  %vm472_vm1 = vcmask 130048   ;;  %v929_v62 = vld [vmem:[%s1184_s1 + $0x120] sm:$0xff]   ;;  %v71_v63 = vpack.c.bf16 %v58_v61, %v58_v61  ;;  %v72_v0 = vpack.c.bf16 %v57_v60, %v57_v60  ;;  %v930_v1 = vld [vmem:[%s1184_s1 + $0x158] sm:$0xff]   ;;  %v70_v9 = vpack.c.bf16 %v50_v59, %v50_v59 }
  0x2a   :  { %v931_v2 = vld [vmem:[%s1184_s1 + $0x118] sm:$0xff]   ;;  %v932_v3 = vld [vmem:[%s1184_s1 + $0x150] sm:$0xff]   ;;  %v934_v5 = vld [vmem:[%s1184_s1 + $0x148] sm:$0xff]   ;;  %vm677_vm2 = vcmask 523264  }
  0x2b   :  { %843 = vmatpush3.bf16.msra.mxu0 %v927_v54  ;;  %588 = vmatprep.mubr.bf16.mxu0 %v71_v63  ;;  %v933_v4 = vld [vmem:[%s1184_s1 + $0x110] sm:$0xff]   ;;  %v935_v6 = vld [vmem:[%s1184_s1 + $0x108] sm:$0xff]   ;;  %v936_v7 = vld [vmem:[%s1184_s1 + $0x140] sm:$0xff]  }
  0x2c   :  { %844 = vmatprep.subr.bf16.mxu0 %v928_v55  ;;  %870 = vmatmul.mubr.msk.bf16.vlgmr.msra.gmra.mxu1 %vm472_vm1, %v72_v0  ;;  %v937_v8 = vld [vmem:[%s1184_s1 + $0x100] sm:$0xff]   ;;  %v940_v10 = vld [vmem:[%s1186_s3 + $0x18] sm:$0xff]   ;;  %v941_v11 = vld [vmem:[%s1186_s3 + $0x10] sm:$0xff]  }
  0x2d   :  { %881 = vmatprep.mubr.msk.bf16.mxu1 %vm968_vm0, %v967_v40  ;;  %874 = vmatpush3.bf16.msra.mxu1 %v940_v10  ;;  %v942_v12 = vld [vmem:[%s1186_s3 + $0x8] sm:$0xff]   ;;  %v943_v13 = vld [vmem:[%s1186_s3] sm:$0xff]  }
  0x2e   :  { %875 = vmatprep.subr.bf16.mxu1 %v967_v40  ;;  %v737_v27 = vld [vmem:[%s1185_s2] ss:$0 sm:$0xff]  ;;  %s969_s2 = smov [#allocation2]  }
  0x2f   :  { %845 = vmatpush3.bf16.msra.mxu0 %v929_v62  ;;  %s729_s0 = sshll.u32 %s969_s2, 4  ;;  %s730_s0 = int_to_ptr.vmem [resolvable:$true] %s729_s0 }
  0x30   :  { %846 = vmatprep.subr.bf16.mxu0 %v930_v1  ;;  %s944_s29 = scalar_lea.vmem %s730_s0, 16  ;;  %s948_s30 = scalar_lea.vmem %s730_s0, 32 }
  0x31   :  { %876 = vmatpush3.bf16.msra.mxu1 %v941_v11  ;;  %p945_p0 = scmp.ne.s32.totalorder %s730_s0, %s944_s29  ;;  %p949_p1 = scmp.lt.s32.totalorder %s730_s0, %s730_s0 }
  0x32   :  { %877 = vmatprep.subr.bf16.mxu1 %v967_v40  ;;  %p950_p2 = scmp.lt.s32.totalorder %s948_s30, %s944_s29 }
  0x33   :  { %847 = vmatpush3.bf16.msra.mxu0 %v931_v2 }
  0x34   :  { %848 = vmatprep.subr.bf16.mxu0 %v932_v3  ;;  %p951_p3 = por %p950_p2, %p949_p1 }
  0x35   :  { %878 = vmatpush3.bf16.msra.mxu1 %v942_v12 }
  0x36   :  { %879 = vmatprep.subr.bf16.mxu1 %v967_v40  ;;  %v788_v40 = vld [vmem:[%s1187_s4] ss:$0 sm:$0xff]  ;;  %p952_p4 = pnand %p951_p3, %p945_p0 }
  0x37   :  { %849 = vmatpush3.bf16.msra.mxu0 %v933_v4 }
  0x38   :  { %850 = vmatprep.subr.bf16.mxu0 %v934_v5 }
  0x39   :  { %880 = vmatpush3.bf16.msra.mxu1 %v943_v13 }
  0x3b   :  { %851 = vmatpush3.bf16.msra.mxu0 %v935_v6 }
  0x3c   :  { %852 = vmatprep.subr.bf16.mxu0 %v936_v7 }
  0x3f   :  { %853 = vmatpush3.bf16.msra.mxu0 %v937_v8 }
  0x42   :  { %589 = vmatmul.mubr.bf16.vlgmr.msra.gmra.mxu0 %v70_v9 }
  0xe2   :  { %v810_v14 = vpop.f32.mrf.mxu0 }
  0xe4   :  { %v832_v15 = vpop.f32.mrf.mxu1  ;;  %v811_v16 = vpop.f32.mrf.mxu0 }
  0xe5   :  { %v812_v26 = vadd.f32 %v811_v16, %v810_v14 }
  0xe6   :  { %v833_v17 = vpop.f32.mrf.mxu1  ;;  %v813_v18 = vpop.f32.mrf.mxu0 }
  0xe7   :  { %v511_v28 = vadd.f32 %v812_v26, %v737_v27  ;;  %v834_v29 = vadd.f32 %v833_v17, %v832_v15 }
  0xe8   :  { %v835_v19 = vpop.f32.mrf.mxu1  ;;  %v814_v20 = vpop.f32.mrf.mxu0 }
  0xe9   :  { %v551_v32 = vadd.f32 %v834_v29, %v511_v28 }
  0xea   :  { %v836_v21 = vpop.f32.mrf.mxu1 }
  0xec   :  { %v630_v22 = vpop.f32.mrf.mxu1 }
  0xee   :  { %v871_v23 = vpop.f32.mrf.mxu1 }
  0xf0   :  { %v633_v24 = vpop.f32.mrf.mxu1 }
  0xf2   :  { %v872_v25 = vpop.f32.mrf.mxu1 }
 0x102   :  { %v854_v30 = vpop.f32.mrf.mxu0 }
 0x104   :  { %v855_v31 = vpop.f32.mrf.mxu0 }
 0x105   :  { %v856_v33 = vadd.f32 %v855_v31, %v854_v30 }
 0x106   :  { %v857_v34 = vpop.f32.mrf.mxu0 }
 0x107   :  { %v591_v35 = vadd.f32 %v856_v33, %v551_v32 }
 0x108   :  { %v858_v36 = vpop.f32.mrf.mxu0 }
 0x109   :  { %v631_v37 = vadd.f32 %v630_v22, %v591_v35 }
 0x10b   :  { %v636_v38 = vmax.f32 %v631_v37, 0.0 }
 0x10d   :  { %v637_v39 = vpack.c.bf16 %v636_v38, %v636_v38 }
 0x10f   :  { %882 = vmatmul.mubr.msk.bf16.vlgmr.msra.gmra.mxu1 %vm677_vm2, %v637_v39 }
 0x1cf   :  { %v715_v41 = vpop.f32.mrf.mxu1 }
 0x1d0   :  { %v716_v42 = vadd.f32 %v788_v40, %v715_v41 }
 0x1d1   :  { %v883_v43 = vpop.f32.mrf.mxu1 }
 0x1d2   :  { %v721_v44 = vpack.c.bf16 %v716_v42, %v716_v42 }
 0x1d3   :  { %v718_v45 = vpop.f32.mrf.mxu1 }
 0x1d4   :  { %722 = vst [vmem:[#allocation2] sm:$0x1] %v721_v44 }
 0x1d5   :  { %v884_v46 = vpop.f32.mrf.mxu1 }
 0x1d6   :  { %955 = shalt.err (!%p952_p4)
}
 0x1d7   :  { %732 = dma.vmem_to_hbm [thread:$0]  %s730_s0, 16, %s1188_s5, [#allocation3]  }
 0x1d8   :  { %964 = dma.done.wait [#allocation3], 16  }
 0x1d9   :  { %965 = vsyncadd [#allocation3], 4294967280 }
 0x1da   :  { %736 = vsyncpa [#allocation3], 1 }

</bundles_post_ra>
